<compile_context>
chip_gen: v6e
topology: v6e:2x2x1
jax: 0.10.0
libtpu: 0.0.40
codegen_flags: <defaults>
</compile_context>

<pallas_src>
import functools
import math

import jax
import jax.numpy as jnp
from jax.experimental import pallas as pl
from jax.experimental.pallas import tpu as pltpu


# -----------------------------------------------------------------------------
# Global knobs / tiling helpers
# -----------------------------------------------------------------------------
MXU_DTYPE = jnp.bfloat16      # MXU operand dtype (f32 accumulation everywhere)
WEIGHT_DTYPE = jnp.bfloat16   # weight storage in HBM
ACT_DTYPE = jnp.bfloat16      # inter-kernel activation storage (qkv / kv / q / ctx)

TM_TARGET = 256    # rows (B*S) tile for matmul kernels
TN_TARGET = 256    # output-feature tile
TK_TARGET = 512    # reduction tile
TF_TARGET = 256    # d_ff tile (kept modest so FFN blocks fit v7x's 64 MiB VMEM)
TQ_TARGET = 256    # flash-attention query tile
TKV_TARGET = 256   # flash-attention key/value tile (fills 256-deep MXU on v6e/v7x)
# TODO(synk): per-generation tuning (v5e: TKV=128 + pl.Buffered(3) on K/V;
#             v6e: TM 384-512); a single middle-ground setting is used here.


def _vmem_limit_bytes():
    """~75% of physical VMEM queried from the device; safe 48 MiB fallback."""
    try:
        cap = int(pltpu.get_tpu_info().vmem_capacity_bytes)
        return max(32 * 1024 * 1024, min((cap * 3) // 4, 112 * 1024 * 1024))
    except Exception:
        return 48 * 1024 * 1024


VMEM_LIMIT = _vmem_limit_bytes()


def _tile(dim, target):
    """Largest TPU-friendly divisor of `dim` that is <= target.

    Prefers multiples of 128 (lane), then multiples of 8 (sublane); falls back
    to the full dimension only if no aligned divisor exists.  Never returns a
    block larger than `target` when a legal smaller one exists (VMEM safety)."""
    if dim <= target:
        return dim
    if dim % target == 0:
        return target
    for align in (128, 8):
        cand = (target // align) * align
        while cand >= align:
            if dim % cand == 0:
                return cand
            cand -= align
    return dim


def _compiler_params(dimension_semantics):
    return pltpu.CompilerParams(dimension_semantics=dimension_semantics,
                                vmem_limit_bytes=VMEM_LIMIT)


# -----------------------------------------------------------------------------
# Kernel 1: tiled linear  y = x @ W + b   (M, N, K grid, f32 accumulator)
# -----------------------------------------------------------------------------
def _linear_kernel(x_ref, w_ref, b_ref, o_ref, acc_ref):
    k = pl.program_id(2)

    @pl.when(k == 0)
    def _():
        acc_ref[...] = jnp.zeros_like(acc_ref)

    acc_ref[...] += jnp.dot(x_ref[...].astype(MXU_DTYPE),
                            w_ref[...].astype(MXU_DTYPE),
                            preferred_element_type=jnp.float32)

    @pl.when(k == pl.num_programs(2) - 1)
    def _():
        o_ref[...] = (acc_ref[...] + b_ref[...]).astype(o_ref.dtype)


def linear(x2d, w, b, out_dtype=ACT_DTYPE):
    M, K = x2d.shape
    N = w.shape[1]
    tm, tn, tk = _tile(M, TM_TARGET), _tile(N, TN_TARGET), _tile(K, TK_TARGET)
    return pl.pallas_call(
        _linear_kernel,
        out_shape=jax.ShapeDtypeStruct((M, N), out_dtype),
        grid=(M // tm, N // tn, K // tk),
        in_specs=[
            pl.BlockSpec((tm, tk), lambda i, j, k: (i, k)),
            pl.BlockSpec((tk, tn), lambda i, j, k: (k, j)),
            pl.BlockSpec((1, tn), lambda i, j, k: (0, j)),
        ],
        out_specs=pl.BlockSpec((tm, tn), lambda i, j, k: (i, j)),
        scratch_shapes=[pltpu.VMEM((tm, tn), jnp.float32)],
        compiler_params=_compiler_params(("parallel", "parallel", "arbitrary")),
    )(x2d, w, b.reshape(1, N))


# -----------------------------------------------------------------------------
# Kernel 2: flash-style multi-head attention.
#   grid = (B, q_tile ["parallel"], kv_tile ["arbitrary"])
#   Q/K/V are read straight out of the fused projection array via feature-block
#   offsets.  Compact per-head softmax stats; lane-dense (Tq, D) accumulator.
# -----------------------------------------------------------------------------
def _flash_attn_kernel(*refs, heads, dk, scale, causal, q_tile, kv_tile, has_mask):
    if has_mask:
        q_ref, k_ref, v_ref, km_ref, o_ref, m_sc, l_sc, acc_sc = refs
    else:
        q_ref, k_ref, v_ref, o_ref, m_sc, l_sc, acc_sc = refs
        km_ref = None

    qi = pl.program_id(1)
    t = pl.program_id(2)

    @pl.when(t == 0)
    def _():
        m_sc[...] = jnp.full(m_sc.shape, -jnp.inf, jnp.float32)
        l_sc[...] = jnp.zeros(l_sc.shape, jnp.float32)
        acc_sc[...] = jnp.zeros(acc_sc.shape, jnp.float32)

    def step():
        q = q_ref[0]                # (Tq, D)
        kt = k_ref[0]               # (Tk, D)
        vt = v_ref[0]               # (Tk, D)

        # One combined additive bias (padding / causal), shared by all heads.
        bias = None
        if has_mask:
            # matches torch masked_fill(mask == 0, -1e9)
            bias = jnp.where(km_ref[0] > 0.0, 0.0, -1e9).astype(jnp.float32)  # (1, Tk)
        if causal:
            q_pos = jax.lax.broadcasted_iota(jnp.int32, (q_tile, kv_tile), 0) + qi * q_tile
            k_pos = jax.lax.broadcasted_iota(jnp.int32, (q_tile, kv_tile), 1) + t * kv_tile
            cb = jnp.where(q_pos >= k_pos, 0.0, -1e9).astype(jnp.float32)     # (Tq, Tk)
            bias = cb if bias is None else bias + cb

        # TODO(synk): for dk >= 128 the head loop could become a grid axis /
        # batched contraction; kept as a static loop for layout robustness.
        for h in range(heads):
            sl = slice(h * dk, (h + 1) * dk)
            q_h = q[:, sl].astype(MXU_DTYPE)
            k_h = kt[:, sl].astype(MXU_DTYPE)
            v_h = vt[:, sl].astype(MXU_DTYPE)

            s = jax.lax.dot_general(q_h, k_h, (((1,), (1,)), ((), ())),
                                    preferred_element_type=jnp.float32) * scale
            if bias is not None:
                s = s + bias

            m_prev = m_sc[h]                                   # (Tq, 1)
            l_prev = l_sc[h]
            m_new = jnp.maximum(m_prev, jnp.max(s, axis=-1, keepdims=True))
            alpha = jnp.exp(m_prev - m_new)                    # (Tq, 1) -> cheap EUP
            p = jnp.exp(s - m_new)                             # (Tq, Tk)

            m_sc[h] = m_new
            l_sc[h] = alpha * l_prev + jnp.sum(p, axis=-1, keepdims=True)
            acc_sc[:, sl] = alpha * acc_sc[:, sl] + jax.lax.dot_general(
                p.astype(MXU_DTYPE), v_h, (((1,), (0,)), ((), ())),
                preferred_element_type=jnp.float32)

    if causal:
        # Skip KV tiles entirely above the diagonal (no FLOPs, no exp).
        @pl.when(t * kv_tile < (qi + 1) * q_tile)
        def _():
            step()
    else:
        step()

    @pl.when(t == pl.num_programs(2) - 1)
    def _():
        for h in range(heads):
            sl = slice(h * dk, (h + 1) * dk)
            acc_sc[:, sl] = acc_sc[:, sl] * pl.reciprocal(l_sc[h], approx=True)
        o_ref[0] = acc_sc[...].astype(o_ref.dtype)


def flash_attention(q_arr, q_blk, kv_arr, k_blk, v_blk, key_mask, *,
                    heads, d_model, causal):
    """q_arr: (B, Sq, nq*D); kv_arr: (B, Sk, nkv*D).  q_blk/k_blk/v_blk select
    the D-wide feature block of the fused projection directly via BlockSpec
    offsets (no HBM slicing pass).  key_mask: (B, 1, Sk), 1.0 = attend."""
    B, Sq = q_arr.shape[0], q_arr.shape[1]
    Sk = kv_arr.shape[1]
    dk = d_model // heads
    scale = 1.0 / math.sqrt(dk)
    Tq = _tile(Sq, TQ_TARGET)
    Tk = _tile(Sk, TKV_TARGET)
    n_q, n_kv = Sq // Tq, Sk // Tk
    has_mask = key_mask is not None

    if causal:
        # Clamp above-diagonal KV tiles to the last needed one: same block
        # index as the previous step -> Pallas issues no extra DMA.
        def kv_idx(qi, t):
            return jnp.minimum(t, ((qi + 1) * Tq - 1) // Tk)
    else:
        def kv_idx(qi, t):
            return t

    in_specs = [
        pl.BlockSpec((1, Tq, d_model), lambda b, qi, t: (b, qi, q_blk)),
        pl.BlockSpec((1, Tk, d_model), lambda b, qi, t: (b, kv_idx(qi, t), k_blk)),
        pl.BlockSpec((1, Tk, d_model), lambda b, qi, t: (b, kv_idx(qi, t), v_blk)),
    ]
    inputs = [q_arr, kv_arr, kv_arr]
    if has_mask:
        in_specs.append(pl.BlockSpec((1, 1, Tk), lambda b, qi, t: (b, 0, t)))
        inputs.append(key_mask)

    kernel = functools.partial(_flash_attn_kernel, heads=heads, dk=dk,
                               scale=scale, causal=causal, q_tile=Tq,
                               kv_tile=Tk, has_mask=has_mask)
    return pl.pallas_call(
        kernel,
        out_shape=jax.ShapeDtypeStruct((B, Sq, d_model), ACT_DTYPE),
        grid=(B, n_q, n_kv),
        in_specs=in_specs,
        out_specs=pl.BlockSpec((1, Tq, d_model), lambda b, qi, t: (b, qi, 0)),
        scratch_shapes=[pltpu.VMEM((heads, Tq, 1), jnp.float32),   # running max
                        pltpu.VMEM((heads, Tq, 1), jnp.float32),   # running denom
                        pltpu.VMEM((Tq, d_model), jnp.float32)],   # output accumulator
        compiler_params=_compiler_params(("parallel", "parallel", "arbitrary")),
    )(*inputs)


# -----------------------------------------------------------------------------
# Kernel 3: O-projection fused with residual add + LayerNorm.
#   out = LayerNorm(residual + (ctx @ Wo + bo))      grid = (M_tiles, K_tiles)
# -----------------------------------------------------------------------------
def _oproj_add_ln_kernel(x_ref, w_ref, b_ref, res_ref, g_ref, bt_ref, o_ref,
                         acc_ref, *, eps):
    k = pl.program_id(1)

    @pl.when(k == 0)
    def _():
        acc_ref[...] = jnp.zeros_like(acc_ref)

    acc_ref[...] += jnp.dot(x_ref[...].astype(MXU_DTYPE),
                            w_ref[...].astype(MXU_DTYPE),
                            preferred_element_type=jnp.float32)

    @pl.when(k == pl.num_programs(1) - 1)
    def _():
        h = acc_ref[...] + b_ref[...] + res_ref[...].astype(jnp.float32)
        mu = jnp.mean(h, axis=-1, keepdims=True)
        var = jnp.mean((h - mu) * (h - mu), axis=-1, keepdims=True)
        hn = (h - mu) * jax.lax.rsqrt(var + eps)
        o_ref[...] = (hn * g_ref[...] + bt_ref[...]).astype(o_ref.dtype)


def oproj_add_layernorm(x2d, w, b, res2d, gamma, beta, eps):
    M, K = x2d.shape
    D = w.shape[1]
    tm, tk = _tile(M, TM_TARGET), _tile(K, TK_TARGET)
    return pl.pallas_call(
        functools.partial(_oproj_add_ln_kernel, eps=eps),
        out_shape=jax.ShapeDtypeStruct((M, D), jnp.float32),
        grid=(M // tm, K // tk),
        in_specs=[
            pl.BlockSpec((tm, tk), lambda i, k: (i, k)),
            pl.BlockSpec((tk, D), lambda i, k: (k, 0)),
            pl.BlockSpec((1, D), lambda i, k: (0, 0)),
            pl.BlockSpec((tm, D), lambda i, k: (i, 0)),
            pl.BlockSpec((1, D), lambda i, k: (0, 0)),
            pl.BlockSpec((1, D), lambda i, k: (0, 0)),
        ],
        out_specs=pl.BlockSpec((tm, D), lambda i, k: (i, 0)),
        scratch_shapes=[pltpu.VMEM((tm, D), jnp.float32)],
        compiler_params=_compiler_params(("parallel", "arbitrary")),
    )(x2d, w, b.reshape(1, D), res2d, gamma.reshape(1, D), beta.reshape(1, D))


# -----------------------------------------------------------------------------
# Kernel 4: fused FFN + residual + LayerNorm.
#   out = LayerNorm(residual + (relu(x @ W1 + b1) @ W2 + b2))
#   grid = (M_tiles, F_tiles); the (tm, tf) intermediate never touches HBM.
# -----------------------------------------------------------------------------
def _ffn_add_ln_kernel(x_ref, w1_ref, b1_ref, w2_ref, b2_ref, res_ref,
                       g_ref, bt_ref, o_ref, acc_ref, *, eps):
    f = pl.program_id(1)

    @pl.when(f == 0)
    def _():
        acc_ref[...] = jnp.zeros_like(acc_ref)

    h = jnp.dot(x_ref[...].astype(MXU_DTYPE), w1_ref[...].astype(MXU_DTYPE),
                preferred_element_type=jnp.float32) + b1_ref[...]
    h = jnp.maximum(h, 0.0)  # TODO(synk): activation fixed to ReLU (module takes a callable).
    acc_ref[...] += jnp.dot(h.astype(MXU_DTYPE), w2_ref[...].astype(MXU_DTYPE),
                            preferred_element_type=jnp.float32)

    @pl.when(f == pl.num_programs(1) - 1)
    def _():
        y = acc_ref[...] + b2_ref[...] + res_ref[...].astype(jnp.float32)
        mu = jnp.mean(y, axis=-1, keepdims=True)
        var = jnp.mean((y - mu) * (y - mu), axis=-1, keepdims=True)
        yn = (y - mu) * jax.lax.rsqrt(var + eps)
        o_ref[...] = (yn * g_ref[...] + bt_ref[...]).astype(o_ref.dtype)


def ffn_add_layernorm(x2d, w1, b1, w2, b2, res2d, gamma, beta, eps):
    M, D = x2d.shape
    F = w1.shape[1]
    tm, tf = _tile(M, TM_TARGET), _tile(F, TF_TARGET)
    return pl.pallas_call(
        functools.partial(_ffn_add_ln_kernel, eps=eps),
        out_shape=jax.ShapeDtypeStruct((M, D), jnp.float32),
        grid=(M // tm, F // tf),
        in_specs=[
            pl.BlockSpec((tm, D), lambda i, f: (i, 0)),
            pl.BlockSpec((D, tf), lambda i, f: (0, f)),
            pl.BlockSpec((1, tf), lambda i, f: (0, f)),
            pl.BlockSpec((tf, D), lambda i, f: (f, 0)),
            pl.BlockSpec((1, D), lambda i, f: (0, 0)),
            pl.BlockSpec((tm, D), lambda i, f: (i, 0)),
            pl.BlockSpec((1, D), lambda i, f: (0, 0)),
            pl.BlockSpec((1, D), lambda i, f: (0, 0)),
        ],
        out_specs=pl.BlockSpec((tm, D), lambda i, f: (i, 0)),
        scratch_shapes=[pltpu.VMEM((tm, D), jnp.float32)],
        compiler_params=_compiler_params(("parallel", "arbitrary")),
    )(x2d, w1, b1.reshape(1, F), w2, b2.reshape(1, D), res2d,
      gamma.reshape(1, D), beta.reshape(1, D))


# -----------------------------------------------------------------------------
# Module glue: full decoder layer.
# -----------------------------------------------------------------------------
def decoder_layer(params, x, encoder_output, enc_key_mask, heads, eps):
    """
    x:              (B, S_dec, D)    f32 residual stream (stays f32)
    encoder_output: (B, S_enc, D)
    enc_key_mask:   (B, 1, S_enc)  1.0 = attend, 0.0 = padded   (padding_mask)
    The look-ahead (causal) mask is generated inside the attention kernel.
    TODO(synk): dropout inside ResidualConnection is identity (eval mode);
    arbitrary dense (B,1,Sq,Sk) masks are not streamed (causal + key-mask only).
    """
    B, Sd, D = x.shape
    Se = encoder_output.shape[1]
    x2d = x.reshape(B * Sd, D)
    la, ga, ffn = params["local_attn"], params["global_attn"], params["ffn"]

    # --- masked (local) self-attention + residual_1 (add + LayerNorm) --------
    qkv = linear(x2d, la["w_qkv"], la["b_qkv"])                    # (B*Sd, 3D) bf16
    qkv3 = qkv.reshape(B, Sd, 3 * D)
    ctx1 = flash_attention(qkv3, 0, qkv3, 1, 2, None,
                           heads=heads, d_model=D, causal=True)
    local2d = oproj_add_layernorm(ctx1.reshape(B * Sd, D), la["wo"], la["bo"],
                                  x2d, params["ln1_g"], params["ln1_b"], eps)

    # --- cross (global) attention + residual_2 (add + LayerNorm) -------------
    q = linear(local2d, ga["wq"], ga["bq"])                        # (B*Sd, D)  bf16
    kv = linear(encoder_output.reshape(B * Se, D), ga["w_kv"], ga["b_kv"])
    ctx2 = flash_attention(q.reshape(B, Sd, D), 0,
                           kv.reshape(B, Se, 2 * D), 0, 1,
                           enc_key_mask, heads=heads, d_model=D, causal=False)
    global2d = oproj_add_layernorm(ctx2.reshape(B * Sd, D), ga["wo"], ga["bo"],
                                   local2d, params["ln2_g"], params["ln2_b"], eps)

    # --- position-wise FFN + residual_3 (add + LayerNorm), fully fused -------
    out2d = ffn_add_layernorm(global2d,
                              ffn["w1"], ffn["b1"], ffn["w2"], ffn["b2"],
                              global2d, params["ln3_g"], params["ln3_b"], eps)
    return out2d.reshape(B, Sd, D)


# -----------------------------------------------------------------------------
# Deterministic parameter initialization (weights stored in bf16).
# -----------------------------------------------------------------------------
def init_params(key, d_model, d_ff):
    ks = jax.random.split(key, 10)

    def lin(kk, din, dout):
        w = jax.random.normal(kk, (din, dout), jnp.float32) * (din ** -0.5)
        return w.astype(WEIGHT_DTYPE), jnp.zeros((dout,), jnp.float32)

    # Local (self) attention: fused QKV weight (D, 3D).
    wq, bq = lin(ks[0], d_model, d_model)
    wk, bk = lin(ks[1], d_model, d_model)
    wv, bv = lin(ks[2], d_model, d_model)
    wo_l, bo_l = lin(ks[3], d_model, d_model)
    local = dict(w_qkv=jnp.concatenate([wq, wk, wv], axis=1),
                 b_qkv=jnp.concatenate([bq, bk, bv]),
                 wo=wo_l, bo=bo_l)

    # Global (cross) attention: separate Q, fused K/V weight (D, 2D).
    wq2, bq2 = lin(ks[4], d_model, d_model)
    wk2, bk2 = lin(ks[5], d_model, d_model)
    wv2, bv2 = lin(ks[6], d_model, d_model)
    wo_g, bo_g = lin(ks[7], d_model, d_model)
    glob = dict(wq=wq2, bq=bq2,
                w_kv=jnp.concatenate([wk2, wv2], axis=1),
                b_kv=jnp.concatenate([bk2, bv2]),
                wo=wo_g, bo=bo_g)

    # TODO(synk): optional fp8 storage for FFN weights on v7x not implemented.
    w1, b1 = lin(ks[8], d_model, d_ff)
    w2, b2 = lin(ks[9], d_ff, d_model)

    return {
        "local_attn": local,
        "global_attn": glob,
        "ffn": dict(w1=w1, b1=b1, w2=w2, b2=b2),
        "ln1_g": jnp.ones((d_model,), jnp.float32),
        "ln1_b": jnp.zeros((d_model,), jnp.float32),
        "ln2_g": jnp.ones((d_model,), jnp.float32),
        "ln2_b": jnp.zeros((d_model,), jnp.float32),
        "ln3_g": jnp.ones((d_model,), jnp.float32),
        "ln3_b": jnp.zeros((d_model,), jnp.float32),
    }


if __name__ == "__main__":
    # Small but lane-aligned shapes (d_model multiple of 128 keeps the fused
    # QKV / KV feature-block BlockSpecs tile-aligned).
    B, S_dec, S_enc = 2, 8, 8
    d_model, heads, d_ff = 128, 4, 256
    eps = 1e-6

    key = jax.random.PRNGKey(0)
    k_p, k_x, k_enc = jax.random.split(key, 3)

    params = init_params(k_p, d_model, d_ff)
    x = jax.random.normal(k_x, (B, S_dec, d_model), jnp.float32)
    encoder_output = jax.random.normal(k_enc, (B, S_enc, d_model), jnp.float32)

    # Padding mask over encoder positions (1 = attend): mask the last encoder
    # token of batch 1. Passed as a compact (B, 1, S_enc) key mask; the causal
    # look-ahead mask is generated inside the attention kernel.
    pad = jnp.ones((B, S_enc), jnp.float32).at[1, -1].set(0.0)
    enc_key_mask = pad[:, None, :]   # (B, 1, S_enc)

    out = decoder_layer(params, x, encoder_output, enc_key_mask, heads, eps)
    out = jax.block_until_ready(out)
    assert out.shape == (B, S_dec, d_model)
    print("KERNEL_OK")
</pallas_src>

<mosaic_0001>
module attributes {stable_mosaic.version = 11 : i64} {
  func.func @_linear_kernel(%arg0: i32, %arg1: i32, %arg2: i32, %arg3: memref<16x128xf32, #tpu.memory_space<vmem>>, %arg4: memref<128x128xbf16, #tpu.memory_space<vmem>>, %arg5: memref<1x128xf32, #tpu.memory_space<vmem>>, %arg6: memref<16x128xbf16, #tpu.memory_space<vmem>>, %arg7: memref<16x128xf32, #tpu.memory_space<vmem>>) attributes {dimension_semantics = [#tpu.dimension_semantics<parallel>, #tpu.dimension_semantics<parallel>, #tpu.dimension_semantics<arbitrary>], iteration_bounds = array<i64: 1, 3, 1>, scalar_prefetch = 0 : i64, scratch_operands = 1 : i64, tpu.core_type = #tpu.core_type<tc>, window_params = [{transform_indices = @transform_0, window_bounds = array<i64: 16, 128>}, {transform_indices = @transform_1, window_bounds = array<i64: 128, 128>}, {transform_indices = @transform_2, window_bounds = array<i64: 1, 128>}, {transform_indices = @transform_3, window_bounds = array<i64: 16, 128>}]} {
    %c0_i32 = arith.constant 0 : i32
    %0 = arith.cmpi eq, %arg2, %c0_i32 : i32
    %1 = arith.extui %0 : i1 to i32
    %c0_i32_0 = arith.constant 0 : i32
    %2 = arith.cmpi ne, %1, %c0_i32_0 : i32
    scf.if %2 {
      %cst_10 = arith.constant 0.000000e+00 : f32
      %13 = vector.broadcast %cst_10 : f32 to vector<16x128xf32>
      %c0_11 = arith.constant 0 : index
      %c0_12 = arith.constant 0 : index
      %14 = vector.load %arg7[%c0_11, %c0_12] : memref<16x128xf32, #tpu.memory_space<vmem>>, vector<16x128xf32>
      tpu.vector_store %arg7[%c0_11, %c0_12], %13 {strides = array<i32>} : memref<16x128xf32, #tpu.memory_space<vmem>>, vector<16x128xf32>,
    } else {
    }
    %c0 = arith.constant 0 : index
    %c0_1 = arith.constant 0 : index
    %3 = vector.load %arg7[%c0, %c0_1] : memref<16x128xf32, #tpu.memory_space<vmem>>, vector<16x128xf32>
    %c0_2 = arith.constant 0 : index
    %c0_3 = arith.constant 0 : index
    %4 = vector.load %arg3[%c0_2, %c0_3] : memref<16x128xf32, #tpu.memory_space<vmem>>, vector<16x128xf32>
    %5 = arith.truncf %4 : vector<16x128xf32> to vector<16x128xbf16>
    %c0_4 = arith.constant 0 : index
    %c0_5 = arith.constant 0 : index
    %6 = vector.load %arg4[%c0_4, %c0_5] : memref<128x128xbf16, #tpu.memory_space<vmem>>, vector<128x128xbf16>
    %cst = arith.constant dense<0.000000e+00> : vector<16x128xf32>
    %7 = tpu.matmul %5, %6, %cst {dimension_numbers = #tpu.dot_dimension_numbers<[1], [0], [0], [1], [0, 0, 1, 1], [], []>} : vector<16x128xbf16>, vector<128x128xbf16>, vector<16x128xf32> -> vector<16x128xf32>
    %8 = arith.addf %3, %7 : vector<16x128xf32>
    %c0_6 = arith.constant 0 : index
    %c0_7 = arith.constant 0 : index
    %9 = vector.load %arg7[%c0_6, %c0_7] : memref<16x128xf32, #tpu.memory_space<vmem>>, vector<16x128xf32>
    tpu.vector_store %arg7[%c0_6, %c0_7], %8 {strides = array<i32>} : memref<16x128xf32, #tpu.memory_space<vmem>>, vector<16x128xf32>,
    %c0_i32_8 = arith.constant 0 : i32
    %10 = arith.cmpi eq, %arg2, %c0_i32_8 : i32
    %11 = arith.extui %10 : i1 to i32
    %c0_i32_9 = arith.constant 0 : i32
    %12 = arith.cmpi ne, %11, %c0_i32_9 : i32
    scf.if %12 {
      %c0_10 = arith.constant 0 : index
      %c0_11 = arith.constant 0 : index
      %13 = vector.load %arg7[%c0_10, %c0_11] : memref<16x128xf32, #tpu.memory_space<vmem>>, vector<16x128xf32>
      %c0_12 = arith.constant 0 : index
      %c0_13 = arith.constant 0 : index
      %14 = vector.load %arg5[%c0_12, %c0_13] : memref<1x128xf32, #tpu.memory_space<vmem>>, vector<1x128xf32>
      %15 = vector.broadcast %14 : vector<1x128xf32> to vector<16x128xf32>
      %16 = arith.addf %13, %15 : vector<16x128xf32>
      %17 = arith.truncf %16 : vector<16x128xf32> to vector<16x128xbf16>
      %c0_14 = arith.constant 0 : index
      %c0_15 = arith.constant 0 : index
      %18 = vector.load %arg6[%c0_14, %c0_15] : memref<16x128xbf16, #tpu.memory_space<vmem>>, vector<16x128xbf16>
      tpu.vector_store %arg6[%c0_14, %c0_15], %17 {strides = array<i32>} : memref<16x128xbf16, #tpu.memory_space<vmem>>, vector<16x128xbf16>,
    } else {
    }
    return
  }
  func.func @transform_0(%arg0: i32, %arg1: i32, %arg2: i32) -> (i32, i32) {
    %c0_i32 = arith.constant 0 : i32
    return %arg0, %arg2 : i32, i32
  }
  func.func @transform_1(%arg0: i32, %arg1: i32, %arg2: i32) -> (i32, i32) {
    %c0_i32 = arith.constant 0 : i32
    return %arg2, %arg1 : i32, i32
  }
  func.func @transform_2(%arg0: i32, %arg1: i32, %arg2: i32) -> (i32, i32) {
    %c0_i32 = arith.constant 0 : i32
    %c0_i32_0 = arith.constant 0 : i32
    return %c0_i32, %arg1 : i32, i32
  }
  func.func @transform_3(%arg0: i32, %arg1: i32, %arg2: i32) -> (i32, i32) {
    %c0_i32 = arith.constant 0 : i32
    return %arg0, %arg1 : i32, i32
  }
}

</mosaic_0001>

<bundles_post_ra>
// kernel: tpu_custom_call.1
= control target key start
LH: loop header
LB: loop body
LE: loop exit
PB: predicated region body
PF: predicated region fallthrough
CT: control target
= control target key end

     0   :  { %8 = vsyncpa [#allocation4], 0  ;;  %s1036_s0 = inlined_call_operand.hbm [shape: f32[16,128], index: 0, kind: input, shape index: {}]   ;;  %s1037_s1 = inlined_call_operand.hbm [shape: bf16[128,384], index: 1, kind: input, shape index: {}]   ;;  %s1038_s2 = inlined_call_operand.vmem [shape: f32[1,384], index: 2, kind: input, shape index: {}]   ;;  %s1039_s3 = inlined_call_operand.hbm [shape: bf16[16,384], index: 3, kind: output, shape index: {}]  }
   0x1   :  { %9 = vsyncpa [#allocation7], 0 }
   0x2   :  { %11 = vsyncpa [#allocation7 + $0x1], 0 }
   0x3   :  { %12 = vsyncpa [#allocation5], 0 }
   0x4   :  { %14 = vsyncpa [#allocation5 + $0x1], 0  ;;  %s857_s12 = smov 0   ;;  %s859_s13 = smov 0  }
   0x5   :  { %s861_s14 = smov 0   ;;  %s863_s15 = smov 0  }
   0x6   :  { %s865_s16 = smov 0   ;;  %s867_s17 = smov 0  }
   0x7 LB: > { %1044 = sst [smem:[#allocation12_spill]] %s802_s12  ;;  %s531_s18 = sadd.s32 4294967295, %s822_s17   ;;  %s822_s17 = sphi %s867_s17, %s20_s17   ;;  %s818_s16 = sphi %s865_s16, %s1064_s16   ;;  %s814_s15 = sphi %s863_s15, %s1063_s15   ;;  %s810_s14 = sphi %s861_s14, %s1062_s14   ;;  %s806_s13 = sphi %s859_s13, %s1061_s13   ;;  %s802_s12 = sphi %s857_s12, %s1060_s12  }
   0x8   : > { %s532_s19 = sadd.s32 4294967294, %s822_s17   ;;  %p83_p0 = scmp.ne.s32.totalorder %s810_s14, %s806_s13 }
   0x9   : > { %p84_p1 = scmp.eq.s32.totalorder %s822_s17, 0  ;;  %p89_p2 = scmp.ne.s32.totalorder %s806_s13, %s802_s12 }
   0xa   : > { %p894_p3 = scmp.eq.s32.totalorder %s531_s18, 0  ;;  %p141_p5 = scmp.eq.s32.totalorder %s531_s18, 2 }
   0xb   : > { %p898_p4 = por %p84_p1, %p83_p0  ;;  %p147_p7 = scmp.eq.s32.totalorder %s532_s19, 2 }
   0xc   : > { %p904_p6 = por %p894_p3, %p89_p2  ;;  %p908_p8 = por %p141_p5, %p83_p0 }
   0xd   : > { %p533_p9 = scmp.ge.s32.totalorder %s822_s17, 1  ;;  %p913_p10 = por %p147_p7, %p89_p2 }
   0xe   : > { %s1047_s22 = scalar_select %p904_p6, 1, 0 }
   0xf   : > { %s1048_s23 = scalar_select %p908_p8, 1, 0 }
  0x10   : > { %s1049_s24 = scalar_select %p913_p10, 1, 0 }
  0x11   : > { %p154_p11 = scmp.lt.s32.totalorder %s822_s17, 4  ;;  %s824_s26 = smov [#allocation3]  }
  0x12   : > { %1050 = sst [smem:[#allocation13_spill]] %s1049_s24  ;;  %s170_s27 = sshll.u32 %s824_s26, 4  ;;  %s171_s27 = int_to_ptr.vmem [resolvable:$true] %s170_s27 }
  0x13   : > { %p918_p12 = pnand %p533_p9, %p154_p11  ;;  %p614_p0 = scmp.lt.s32.totalorder %s822_s17, 3 }
  0x14   : > { %s35_s30 = sadd.s32 1, %s818_s16  ;;  %s695_s4 = scalar_lea.vmem %s171_s27, 256 }
  0x15   : > { %p601_p13 = pneg %p918_p12  ;;  %p933_p2 = pnand %p614_p0, %p898_p4 }
  0x16   : > { %p696_p7 = scmp.ne.s32.totalorder %s171_s27, %s695_s4  ;;  %p703_p10 = scmp.lt.s32.totalorder %s171_s27, %s171_s27 }
  0x17   : > { %p927_p1 = pnand %p601_p13, %p894_p3  ;;  %p704_p8 = scmp.lt.s32.totalorder %s695_s4, %s695_s4 }
  0x19   : > { %p686_p5 = pneg %p927_p1  ;;  %p705_p6 = por %p704_p8, %p703_p10 }
  0x1b   : > { %p698_p9 = pnand %p696_p7, %p686_p5 }
  0x1d   : > { %p699_p11 = pneg %p698_p9 }
  0x1f   : > { %p706_p13 = pnand %p705_p6, %p699_p11 }
  0x21   : > { %709 = shalt.err (!%p706_p13)
}
  0x22   : > { %s825_s5 = smov 128   ;;  %s826_s6 = smov 8  }
  0x23   : > { %604 = dma.hbm_to_vmem [thread:$0]  (!%p927_p1), %s1036_s0, 256, %s171_s27, [#allocation4], %s825_s5, %s825_s5, %s826_s6  }
  0x24   : > { %p37_p4 = scmp.ge.s32.totalorder %s35_s30, 3  ;;  %s76_s9 = sadd.s32 1, %s810_s14 }
  0x25   : > { %s184_s10 = sand.u32 1, %s810_s14   ;;  %s537_s19 = sshll.u32 %s818_s16, 6 }
  0x26   : > { %s1066_s30 = smov (%p37_p4, %s35_s30), 0  ;;  %s536_s11 = sshll.u32 %s184_s10, 6 }
  0x27   : > { %s72_s18 = ssub.s32 %s818_s16, %s1066_s30  ;;  %s196_s4 = scalar_lea.hbm %s1037_s1, %s537_s19 }
  0x28   : > { %p74_p6 = scmp.eq.s32.totalorder %s72_s18, 0  ;;  %s188_s28 = scalar_lea.vmem [#allocation6], %s536_s11 }
  0x29   : > { %s197_s24 = sshll.u32 %s188_s28, 4  ;;  %s185_s27 = scalar_lea.sflag [#allocation7], %s184_s10  ;;  %s198_s24 = int_to_ptr.vmem [resolvable:$true] %s197_s24 }
  0x2a   : > { %s956_s12 = scalar_select %p74_p6, %s810_s14, %s76_s9  }
  0x2b   : > { %p712_p8 = pneg %p933_p2  ;;  %s723_s5 = scalar_lea.vmem %s198_s24, 1024 }
  0x2c   : > { %p724_p10 = scmp.ne.s32.totalorder %s198_s24, %s723_s5  ;;  %s827_s6 = smov [#allocation6]  }
  0x2d   : > { %s728_s7 = sshll.u32 %s827_s6, 4  ;;  %s729_s7 = int_to_ptr.vmem [resolvable:$false] %s728_s7 }
  0x2e   : > { %p726_p0 = pnand %p724_p10, %p712_p8  ;;  %s730_s8 = scalar_lea.vmem %s729_s7, 2048 }
  0x2f   : > { %p731_p5 = scmp.lt.s32.totalorder %s198_s24, %s729_s7  ;;  %p732_p7 = scmp.lt.s32.totalorder %s730_s8, %s723_s5 }
  0x30   : > { %p727_p1 = pneg %p726_p0 }
  0x31   : > { %p733_p9 = por %p732_p7, %p731_p5 }
  0x33   : > { %p734_p11 = pnand %p733_p9, %p727_p1 }
  0x35   : > { %737 = shalt.err (!%p734_p11)
}
  0x36   : > { %s828_s11 = smov 192   ;;  %s829_s9 = smov 64  }
  0x37   : > { %s830_s18 = smov 4   ;;  %215 = sbr.rel (%p918_p12) target bundleno = 314 (0x13a), region = 32 }
  0x38   : > { %608 = dma.hbm_to_vmem [thread:$0]  (!%p933_p2), %s196_s4, 1024, %s198_s24, %s185_s27, %s828_s11, %s829_s9, %s830_s18  }
  0x3c   : > { %789 = dma.done.wait (%p894_p3), [#allocation4], 256  }
  0x3d   : > { %791 = vsyncadd (%p894_p3), [#allocation4], 4294967040  ;;  %s969_s10 = sand.u32 1, %s806_s13   ;;  %p1054_p13 = scmp.ne.s32.totalorder %s1047_s22, 0 }
  0x3e   : > { %s540_s19 = sshll.u32 %s969_s10, 6  ;;  %s222_s21 = scalar_lea.sflag [#allocation7], %s969_s10 }
  0x3f   : > { %s225_s26 = scalar_lea.vmem [#allocation6], %s540_s19 }
  0x40   : > { %793 = dma.done.wait (%p1054_p13), %s222_s21, 1024  }
  0x41   : > { %795 = vsyncadd (%p1054_p13), %s222_s21, 4294966272  ;;  %v831_v0 = vmov 0.0   ;;  %vm832_vm0 = vmmov 0   ;;  %v676_v1 = vld [vmem:[%s225_s26 + $0x38] sm:$0xff]   ;;  %v677_v2 = vld [vmem:[%s225_s26 + $0x30] sm:$0xff]   ;;  %p253_p3 = scmp.lt.s32.totalorder %s814_s15, 2 }
  0x42   : > { %573 = vmatprep.subr.bf16.mxu0 %v831_v0  ;;  %589 = vmatprep.mubr.msk.bf16.mxu0 %vm832_vm0, %v831_v0  ;;  %v678_v3 = vld [vmem:[%s225_s26 + $0x28] sm:$0xff]   ;;  %v679_v4 = vld [vmem:[%s225_s26 + $0x20] sm:$0xff]   ;;  %v680_v5 = vld [vmem:[%s225_s26 + $0x18] sm:$0xff]   ;;  %s541_s22 = sshll.u32 %s969_s10, 3  ;;  %s554_s27 = sshll.u32 %s814_s15, 6 }
  0x43   : > { %574 = vmatpush3.bf16.msra.mxu0 %v676_v1  ;;  %v681_v6 = vld [vmem:[%s225_s26 + $0x10] sm:$0xff]   ;;  %v682_v7 = vld [vmem:[%s225_s26 + $0x8] sm:$0xff]   ;;  %v683_v8 = vld [vmem:[%s225_s26] sm:$0xff]   ;;  %s254_s20 = scalar_select %p253_p3, %s814_s15, 2 }
  0x44   : > { %575 = vmatprep.subr.bf16.mxu0 %v831_v0  ;;  %v266_v9 = vld [vmem:[#allocation3] sm:$0xff]  ;;  %v267_v10 = vld [vmem:[#allocation3 + $0x8] sm:$0xff]  ;;  %s250_s4 = scalar_lea.vmem [#allocation8], %s541_s22  ;;  %s989_s7 = scalar_lea.hbm %s1039_s3, %s554_s27 }
  0x45   : > { %v268_v11 = vpack.c.bf16 %v267_v10, %v266_v9  ;;  %s255_s29 = scalar_lea.vmem %s1038_s2, %s254_s20  ;;  %s418_s28 = sshll.u32 %s250_s4, 4  ;;  %s984_s28 = int_to_ptr.vmem [resolvable:$true] %s418_s28 }
  0x46   : > { %v550_v13 = vld [vmem:[%s255_s29] ss:$0 sm:$0xff]  ;;  %s403_s8 = scalar_lea.sflag [#allocation5], %s969_s10  ;;  %s738_s11 = scalar_lea.vmem %s984_s28, 128 }
  0x47   : > { %576 = vmatpush3.bf16.msra.mxu0 %v677_v2  ;;  %p739_p12 = scmp.ne.s32.totalorder %s984_s28, %s738_s11  ;;  %p1055_p2 = scmp.ne.s32.totalorder %s1048_s23, 0 }
  0x48   : > { %577 = vmatprep.subr.bf16.mxu0 %v831_v0  ;;  %s833_s15 = smov [#allocation8]  }
  0x49   : > { %p740_p4 = pnand %p739_p12, %p1055_p2  ;;  %s742_s9 = sshll.u32 %s833_s15, 4  ;;  %s743_s9 = int_to_ptr.vmem [resolvable:$false] %s742_s9 }
  0x4a   : > { %s744_s18 = scalar_lea.vmem %s743_s9, 256  ;;  %p745_p8 = scmp.lt.s32.totalorder %s984_s28, %s743_s9 }
  0x4b   : > { %578 = vmatpush3.bf16.msra.mxu0 %v678_v3  ;;  %p741_p6 = pneg %p740_p4  ;;  %p746_p10 = scmp.lt.s32.totalorder %s744_s18, %s738_s11 }
  0x4c   : > { %579 = vmatprep.subr.bf16.mxu0 %v831_v0 }
  0x4d   : > { %p747_p0 = por %p746_p10, %p745_p8 }
  0x4f   : > { %580 = vmatpush3.bf16.msra.mxu0 %v679_v4  ;;  %p748_p1 = pnand %p747_p0, %p741_p6 }
  0x50   : > { %581 = vmatprep.subr.bf16.mxu0 %v831_v0 }
  0x53   : > { %582 = vmatpush3.bf16.msra.mxu0 %v680_v5 }
  0x54   : > { %583 = vmatprep.subr.bf16.mxu0 %v831_v0 }
  0x57   : > { %584 = vmatpush3.bf16.msra.mxu0 %v681_v6 }
  0x58   : > { %585 = vmatprep.subr.bf16.mxu0 %v831_v0 }
  0x5b   : > { %586 = vmatpush3.bf16.msra.mxu0 %v682_v7 }
  0x5c   : > { %587 = vmatprep.subr.bf16.mxu0 %v831_v0 }
  0x5f   : > { %588 = vmatpush3.bf16.msra.mxu0 %v683_v8 }
  0x62   : > { %590 = vmatmul.mubr.bf16.vlgmr.msra.gmra.mxu0 %v268_v11 }
 0x122   : > { %v367_v12 = vpop.f32.mrf.mxu0 }
 0x123   : > { %v390_v16 = vadd.f32 %v550_v13, %v367_v12 }
 0x124   : > { %v591_v14 = vpop.f32.mrf.mxu0 }
 0x126   : > { %v370_v15 = vpop.f32.mrf.mxu0 }
 0x127   : > { %v391_v17 = vadd.f32 %v550_v13, %v370_v15 }
 0x128   : > { %v592_v18 = vpop.f32.mrf.mxu0 }
 0x129   : > { %v562_v19 = vpack.c.bf16 %v391_v17, %v390_v16 }
 0x12b   : > { %563 = vst [vmem:[%s250_s4] sm:$0xff] %v562_v19  }
 0x12c   : > { %751 = shalt.err (!%p748_p1)
}
 0x12d   : > { %s752_s19 = scalar_lea.hbm %s989_s7, 128  ;;  %s756_s20 = scalar_lea.hbm %s1039_s3, 384 }
 0x12e   : > { %p753_p5 = scmp.ne.s32.totalorder %s989_s7, %s752_s19  ;;  %p757_p11 = scmp.lt.s32.totalorder %s989_s7, %s1039_s3 }
 0x12f   : > { %p758_p13 = scmp.lt.s32.totalorder %s756_s20, %s752_s19 }
 0x130   : > { %p754_p7 = pnand %p753_p5, %p1055_p2 }
 0x131   : > { %p759_p3 = por %p758_p13, %p757_p11 }
 0x132   : > { %p755_p9 = pneg %p754_p7 }
 0x134   : > { %p760_p12 = pnand %p759_p3, %p755_p9 }
 0x136   : > { %763 = shalt.err (!%p760_p12)
}
 0x137   : > { %s834_s25 = smov 64   ;;  %s835_s29 = smov 192  }
 0x138   : > { %s836_s4 = smov 4  }
 0x139   : > { %599 = dma.vmem_to_hbm [thread:$0]  (%p1055_p2), %s984_s28, 128, %s989_s7, %s403_s8, %s834_s25, %s835_s29, %s836_s4  }
 0x13a PF: > { %s1056_s27 = sld [smem:[#allocation12_spill]]  ;;  %p616_p4 = scmp.ge.s32.totalorder %s822_s17, 2 }
 0x13b   : > { %s1057_s5 = sld [smem:[#allocation13_spill]] }
 0x140   : > { %s433_s6 = sand.u32 1, %s1056_s27  }
 0x141   : > { %p1058_p6 = scmp.ne.s32.totalorder %s1057_s5, 0  ;;  %s434_s11 = scalar_lea.sflag [#allocation5], %s433_s6 }
 0x143   : > { %p610_p8 = pnand %p616_p4, %p1058_p6 }
 0x145   : > { %p611_p10 = pneg %p610_p8 }
 0x147   : > { %797 = dma.done.wait (%p611_p10), %s434_s11, 128  }
 0x148   : > { %799 = vsyncadd (%p611_p10), %s434_s11, 4294967168  ;;  %s20_s17 = sadd.s32 1, %s822_s17   ;;  %s1059_s23 = smov %s956_s12 }
 0x149   : > { %p17_p0 = scmp.ge.s32.totalorder %s20_s17, 5   ;;  %s1060_s12 = smov %s806_s13 }
 0x14a   : > { %s1061_s13 = smov %s810_s14  ;;  %s1062_s14 = smov %s1059_s23 }
 0x14b   : > { %s1063_s15 = smov %s818_s16  ;;  %s1064_s16 = smov %s1066_s30 }
 0x14c   :  { %19 = sbr.rel (!%p17_p0) target bundleno = 7 (0x7), region = 94 }
 0x151   :  { %439 = vsyncpa [#allocation4], 1 }
 0x152   :  { %441 = vsyncpa [#allocation4 + $0x1], 1 }
 0x153   :  { %442 = vsyncpa [#allocation7], 1 }
 0x154   :  { %444 = vsyncpa [#allocation7 + $0x1], 1 }
 0x155   :  { %445 = vsyncpa [#allocation5], 1 }
 0x156   :  { %447 = vsyncpa [#allocation5 + $0x1], 1 }

</bundles_post_ra>
